<compile_context>
chip_gen: v6e
topology: v6e:2x2x1
jax: 0.10.0
libtpu: 0.0.40
codegen_flags: <defaults>
</compile_context>

<pallas_src>
import functools

import numpy as np
import jax
import jax.numpy as jnp
from jax.experimental import pallas as pl
from jax.experimental.pallas import tpu as pltpu


# ----------------------------------------------------------------------------------
# Pallas kernel: in-kernel zero-pad + full 2-D FIR on a block of planes
# ----------------------------------------------------------------------------------
def _blur_fir_kernel(x_ref, o_ref, xpad_ref, *, p0, kv_taps, kh_taps, w2d_flip):
    """x_ref: (pb, H, W) input block (native dtype);
       o_ref: (pb, Ho, Wo) output block (native dtype);
       xpad_ref: (pb, Hp, Wp) f32 VMEM scratch used as zero-padded staging.

    out[p, y, x] = sum_{i,j} w2d_flip[i][j] * xpad[p, y + i, x + j]
    where xpad is the zero-padded input; w2d_flip is the flipped FIR kernel, so
    this matches upfirdn2d_native's F.conv2d(padded, flip(kernel)).
    """
    _, H, W = x_ref.shape
    _, Ho, Wo = o_ref.shape
    pb, Hp, Wp = xpad_ref.shape

    # Stage the block into a zero-padded f32 scratch (VMEM-only traffic; the
    # external jnp.pad pass from the previous version is gone).
    if Hp != H or Wp != W:
        xpad_ref[...] = jnp.zeros_like(xpad_ref)
    xpad_ref[:, p0:p0 + H, p0:p0 + W] = x_ref[...].astype(jnp.float32)

    if kv_taps is not None:
        # Separable FIR: vertical (sublane shifts) then horizontal (lane shifts),
        # kh + kw taps instead of kh * kw.
        v = None
        for i, wi in enumerate(kv_taps):
            if wi == 0.0:
                continue
            t = wi * xpad_ref[:, i:i + Ho, :]
            v = t if v is None else v + t
        if v is None:
            v = jnp.zeros((pb, Ho, Wp), jnp.float32)
        acc = None
        for j, wj in enumerate(kh_taps):
            if wj == 0.0:
                continue
            t = wj * v[:, :, j:j + Wo]
            acc = t if acc is None else acc + t
    else:
        # Non-separable 2-D kernel fallback (kh * kw taps).
        acc = None
        for i, row in enumerate(w2d_flip):
            for j, wij in enumerate(row):
                if wij == 0.0:
                    continue
                t = wij * xpad_ref[:, i:i + Ho, j:j + Wo]
                acc = t if acc is None else acc + t

    if acc is None:  # degenerate all-zero kernel
        acc = jnp.zeros((pb, Ho, Wo), jnp.float32)
    o_ref[...] = acc.astype(o_ref.dtype)


# ----------------------------------------------------------------------------------
# Wrapper: upfirdn2d with up=down=1 (the only mode Blur.forward uses)
# ----------------------------------------------------------------------------------
def upfirdn2d_blur(x, kv_taps, kh_taps, w2d_flip, pad,
                   *, vmem_budget_bytes=6 * 1024 * 1024):
    """x: (B, C, H, W). Returns (B, C, Ho, Wo) in x.dtype."""
    p0, p1 = int(pad[0]), int(pad[1])
    B, C, H, W = x.shape
    ksize_h = len(w2d_flip)
    ksize_w = len(w2d_flip[0])

    # negative pad == crop (same semantics as upfirdn2d_native with a 2-elem pad)
    ct, cb = max(-p0, 0), max(-p1, 0)
    if ct or cb:
        x = x[:, :, ct:H - cb, ct:W - cb]
        B, C, H, W = x.shape
    p0, p1 = max(p0, 0), max(p1, 0)

    Hp, Wp = H + p0 + p1, W + p0 + p1
    Ho, Wo = Hp - ksize_h + 1, Wp - ksize_w + 1
    assert Ho > 0 and Wo > 0, "blur kernel larger than padded input"

    P = B * C
    xr = x.reshape(P, H, W)                       # free reshape, no transpose

    # Per-plane VMEM footprint: double-buffered in/out blocks (native dtype) +
    # f32 pad scratch + in-kernel f32 temporaries (vertical intermediate,
    # accumulator, one shifted slice). Conservative default budget fits the
    # scoped VMEM window on v5e (16 MiB), v6e and v7x (32 MiB).
    itemsize = np.dtype(x.dtype).itemsize
    per_plane = ((2 * H * W + 2 * Ho * Wo) * itemsize
                 + (Hp * Wp + Ho * Wp + 2 * Ho * Wo) * 4)
    pb_budget = max(1, vmem_budget_bytes // max(per_plane, 1))
    # Cap so the grid has >= ~4 steps when possible: gives the pipeline work to
    # overlap and lets the "parallel" axis shard across both TCs on v7x.
    pb = int(max(1, min(P, pb_budget, pl.cdiv(P, 4))))
    n_blocks = pl.cdiv(P, pb)

    kernel = functools.partial(_blur_fir_kernel, p0=p0,
                               kv_taps=kv_taps, kh_taps=kh_taps,
                               w2d_flip=w2d_flip)
    out = pl.pallas_call(
        kernel,
        out_shape=jax.ShapeDtypeStruct((P, Ho, Wo), x.dtype),
        grid_spec=pltpu.PrefetchScalarGridSpec(
            num_scalar_prefetch=0,
            grid=(n_blocks,),
            # last two block dims == full array dims -> no (8,128) divisibility issue
            in_specs=[pl.BlockSpec((pb, H, W), lambda p: (p, 0, 0))],
            out_specs=pl.BlockSpec((pb, Ho, Wo), lambda p: (p, 0, 0)),
            scratch_shapes=[pltpu.VMEM((pb, Hp, Wp), jnp.float32)],
        ),
        compiler_params=pltpu.CompilerParams(
            dimension_semantics=("parallel",)),
    )(xr)
    return out.reshape(B, C, Ho, Wo)


# ----------------------------------------------------------------------------------
# Blur module (JAX/Pallas port of the PyTorch nn.Module)
# ----------------------------------------------------------------------------------
class Blur:
    def __init__(self, kernel, pad, upsample_factor=1):
        k = np.asarray(kernel, dtype=np.float64)
        gain = float(upsample_factor) ** 2 if upsample_factor > 1 else 1.0
        if k.ndim == 1:
            # separable: outer(k, k) / sum(k)^2 * gain == outer(kv, kh) below
            s = float(k.sum())
            kf = k[::-1]
            self.kv_taps = tuple(float(v) / s for v in kf)           # vertical, flipped
            self.kh_taps = tuple(float(v) * gain / s for v in kf)    # horizontal, flipped (+gain)
            k2d = np.outer(k, k)
        else:
            self.kv_taps = None
            self.kh_taps = None
            k2d = k
        k2d = k2d / k2d.sum() * gain
        self.kernel2d = jnp.asarray(k2d, jnp.float32)                # for the reference check
        kflip = k2d[::-1, ::-1]
        self.w2d_flip = tuple(tuple(float(v) for v in row) for row in kflip)
        self.pad = (int(pad[0]), int(pad[1]))

    def __call__(self, x):
        return upfirdn2d_blur(x, self.kv_taps, self.kh_taps, self.w2d_flip, self.pad)


# ----------------------------------------------------------------------------------
# Plain-JAX reference (mirrors upfirdn2d_native with up=down=1) for validation
# ----------------------------------------------------------------------------------
def _upfirdn2d_reference(x, kernel2d, pad):
    p0, p1 = pad
    B, C, H, W = x.shape
    kh, kw = kernel2d.shape
    ct, cb = max(-p0, 0), max(-p1, 0)
    x = x[:, :, ct:H - cb, ct:W - cb]
    p0n, p1n = max(p0, 0), max(p1, 0)
    xp = jnp.pad(x.astype(jnp.float32), ((0, 0), (0, 0), (p0n, p1n), (p0n, p1n)))
    kf = kernel2d[::-1, ::-1]
    Ho = xp.shape[2] - kh + 1
    Wo = xp.shape[3] - kw + 1
    out = jnp.zeros((B, C, Ho, Wo), jnp.float32)
    for i in range(kh):
        for j in range(kw):
            out = out + kf[i, j] * xp[:, :, i:i + Ho, j:j + Wo]
    return out


if __name__ == "__main__":
    key = jax.random.PRNGKey(0)
    x = jax.random.normal(key, (2, 4, 16, 16), jnp.float32)

    # Standard StyleGAN blur config: 1-D taps [1,3,3,1], pad=(2,1) (keeps 16x16 -> 16x16).
    blur = Blur(kernel=[1, 3, 3, 1], pad=(2, 1))

    # float32 path
    out = jax.block_until_ready(blur(x))
    assert out.shape == (2, 4, 16, 16), out.shape
    assert out.dtype == x.dtype, out.dtype
    ref = _upfirdn2d_reference(x, blur.kernel2d, blur.pad)
    err = float(jnp.max(jnp.abs(out.astype(jnp.float32) - ref)))
    assert err < 1e-5, f"f32 max abs err {err}"
    assert bool(jnp.all(jnp.isfinite(out)))

    # native-dtype (bf16) I/O path: bf16 in/out of HBM, f32 accumulation in-kernel.
    xb = x.astype(jnp.bfloat16)
    outb = jax.block_until_ready(blur(xb))
    assert outb.shape == (2, 4, 16, 16) and outb.dtype == jnp.bfloat16
    refb = _upfirdn2d_reference(xb, blur.kernel2d, blur.pad)
    errb = float(jnp.max(jnp.abs(outb.astype(jnp.float32) - refb)))
    assert errb < 5e-2, f"bf16 max abs err {errb}"
    assert bool(jnp.all(jnp.isfinite(outb.astype(jnp.float32))))

    print("KERNEL_OK")
</pallas_src>

<mosaic_0001>
module attributes {stable_mosaic.version = 11 : i64} {
  func.func @_blur_fir_kernel(%arg0: i32, %arg1: memref<2x16x16xf32, #tpu.memory_space<vmem>>, %arg2: memref<2x16x16xf32, #tpu.memory_space<vmem>>, %arg3: memref<2x19x19xf32, #tpu.memory_space<vmem>>) attributes {dimension_semantics = [#tpu.dimension_semantics<parallel>], iteration_bounds = array<i64: 4>, scalar_prefetch = 0 : i64, scratch_operands = 1 : i64, tpu.core_type = #tpu.core_type<tc>, window_params = [{transform_indices = @transform_0, window_bounds = array<i64: 2, 16, 16>}, {transform_indices = @transform_1, window_bounds = array<i64: 2, 16, 16>}]} {
    %cst = arith.constant 0.000000e+00 : f32
    %0 = vector.broadcast %cst : f32 to vector<2x19x19xf32>
    %c0 = arith.constant 0 : index
    %c0_0 = arith.constant 0 : index
    %c0_1 = arith.constant 0 : index
    %1 = vector.load %arg3[%c0, %c0_0, %c0_1] : memref<2x19x19xf32, #tpu.memory_space<vmem>>, vector<2x19x19xf32>
    tpu.vector_store %arg3[%c0, %c0_0, %c0_1], %0 {strides = array<i32>} : memref<2x19x19xf32, #tpu.memory_space<vmem>>, vector<2x19x19xf32>,
    %c0_2 = arith.constant 0 : index
    %c0_3 = arith.constant 0 : index
    %c0_4 = arith.constant 0 : index
    %2 = vector.load %arg1[%c0_2, %c0_3, %c0_4] : memref<2x16x16xf32, #tpu.memory_space<vmem>>, vector<2x16x16xf32>
    %c0_5 = arith.constant 0 : index
    %c2 = arith.constant 2 : index
    %c2_6 = arith.constant 2 : index
    %3 = vector.load %arg3[%c0_5, %c2, %c2_6] : memref<2x19x19xf32, #tpu.memory_space<vmem>>, vector<2x16x16xf32>
    tpu.vector_store %arg3[%c0_5, %c2, %c2_6], %2 {strides = array<i32>} : memref<2x19x19xf32, #tpu.memory_space<vmem>>, vector<2x16x16xf32>,
    %c0_7 = arith.constant 0 : index
    %c0_8 = arith.constant 0 : index
    %c0_9 = arith.constant 0 : index
    %4 = vector.load %arg3[%c0_7, %c0_8, %c0_9] : memref<2x19x19xf32, #tpu.memory_space<vmem>>, vector<2x16x19xf32>
    %cst_10 = arith.constant 1.250000e-01 : f32
    %5 = vector.broadcast %cst_10 : f32 to vector<2x16x19xf32>
    %6 = arith.mulf %5, %4 : vector<2x16x19xf32>
    %c0_11 = arith.constant 0 : index
    %c1 = arith.constant 1 : index
    %c0_12 = arith.constant 0 : index
    %7 = vector.load %arg3[%c0_11, %c1, %c0_12] : memref<2x19x19xf32, #tpu.memory_space<vmem>>, vector<2x16x19xf32>
    %cst_13 = arith.constant 3.750000e-01 : f32
    %8 = vector.broadcast %cst_13 : f32 to vector<2x16x19xf32>
    %9 = arith.mulf %8, %7 : vector<2x16x19xf32>
    %10 = arith.addf %6, %9 : vector<2x16x19xf32>
    %c0_14 = arith.constant 0 : index
    %c2_15 = arith.constant 2 : index
    %c0_16 = arith.constant 0 : index
    %11 = vector.load %arg3[%c0_14, %c2_15, %c0_16] : memref<2x19x19xf32, #tpu.memory_space<vmem>>, vector<2x16x19xf32>
    %cst_17 = arith.constant 3.750000e-01 : f32
    %12 = vector.broadcast %cst_17 : f32 to vector<2x16x19xf32>
    %13 = arith.mulf %12, %11 : vector<2x16x19xf32>
    %14 = arith.addf %10, %13 : vector<2x16x19xf32>
    %c0_18 = arith.constant 0 : index
    %c3 = arith.constant 3 : index
    %c0_19 = arith.constant 0 : index
    %15 = vector.load %arg3[%c0_18, %c3, %c0_19] : memref<2x19x19xf32, #tpu.memory_space<vmem>>, vector<2x16x19xf32>
    %cst_20 = arith.constant 1.250000e-01 : f32
    %16 = vector.broadcast %cst_20 : f32 to vector<2x16x19xf32>
    %17 = arith.mulf %16, %15 : vector<2x16x19xf32>
    %18 = arith.addf %14, %17 : vector<2x16x19xf32>
    %19 = vector.extract_strided_slice %18 {offsets = [0, 0, 0], sizes = [2, 16, 16], strides = [1, 1, 1]} : vector<2x16x19xf32> to vector<2x16x16xf32>
    %cst_21 = arith.constant 1.250000e-01 : f32
    %20 = vector.broadcast %cst_21 : f32 to vector<2x16x16xf32>
    %21 = arith.mulf %20, %19 : vector<2x16x16xf32>
    %22 = vector.extract_strided_slice %18 {offsets = [0, 0, 1], sizes = [2, 16, 16], strides = [1, 1, 1]} : vector<2x16x19xf32> to vector<2x16x16xf32>
    %cst_22 = arith.constant 3.750000e-01 : f32
    %23 = vector.broadcast %cst_22 : f32 to vector<2x16x16xf32>
    %24 = arith.mulf %23, %22 : vector<2x16x16xf32>
    %25 = arith.addf %21, %24 : vector<2x16x16xf32>
    %26 = vector.extract_strided_slice %18 {offsets = [0, 0, 2], sizes = [2, 16, 16], strides = [1, 1, 1]} : vector<2x16x19xf32> to vector<2x16x16xf32>
    %cst_23 = arith.constant 3.750000e-01 : f32
    %27 = vector.broadcast %cst_23 : f32 to vector<2x16x16xf32>
    %28 = arith.mulf %27, %26 : vector<2x16x16xf32>
    %29 = arith.addf %25, %28 : vector<2x16x16xf32>
    %30 = vector.extract_strided_slice %18 {offsets = [0, 0, 3], sizes = [2, 16, 16], strides = [1, 1, 1]} : vector<2x16x19xf32> to vector<2x16x16xf32>
    %cst_24 = arith.constant 1.250000e-01 : f32
    %31 = vector.broadcast %cst_24 : f32 to vector<2x16x16xf32>
    %32 = arith.mulf %31, %30 : vector<2x16x16xf32>
    %33 = arith.addf %29, %32 : vector<2x16x16xf32>
    %c0_25 = arith.constant 0 : index
    %c0_26 = arith.constant 0 : index
    %c0_27 = arith.constant 0 : index
    %34 = vector.load %arg2[%c0_25, %c0_26, %c0_27] : memref<2x16x16xf32, #tpu.memory_space<vmem>>, vector<2x16x16xf32>
    tpu.vector_store %arg2[%c0_25, %c0_26, %c0_27], %33 {strides = array<i32>} : memref<2x16x16xf32, #tpu.memory_space<vmem>>, vector<2x16x16xf32>,
    return
  }
  func.func @transform_0(%arg0: i32) -> (i32, i32, i32) {
    %c0_i32 = arith.constant 0 : i32
    %c0_i32_0 = arith.constant 0 : i32
    %c0_i32_1 = arith.constant 0 : i32
    return %arg0, %c0_i32, %c0_i32_0 : i32, i32, i32
  }
  func.func @transform_1(%arg0: i32) -> (i32, i32, i32) {
    %c0_i32 = arith.constant 0 : i32
    %c0_i32_0 = arith.constant 0 : i32
    %c0_i32_1 = arith.constant 0 : i32
    return %arg0, %c0_i32, %c0_i32_0 : i32, i32, i32
  }
}

</mosaic_0001>

<bundles_post_ra>
// kernel: tpu_custom_call.1
= control target key start
LH: loop header
LB: loop body
LE: loop exit
PB: predicated region body
PF: predicated region fallthrough
CT: control target
= control target key end

     0   :  { %6 = vsyncpa [#allocation4], 0  ;;  %s722_s0 = inlined_call_operand.hbm [shape: f32[8,16,16], index: 0, kind: input, shape index: {}]   ;;  %s723_s1 = inlined_call_operand.hbm [shape: f32[8,16,16], index: 1, kind: output, shape index: {}]  }
   0x1   :  { %8 = vsyncpa [#allocation4 + $0x1], 0 }
   0x2   :  { %9 = vsyncpa [#allocation5], 0 }
   0x3   :  { %11 = vsyncpa [#allocation5 + $0x1], 0  ;;  %s562_s6 = smov 0   ;;  %s564_s7 = smov 0  }
   0x4   :  { %s566_s8 = smov 0   ;;  %s568_s9 = smov 0  }
   0x5 LB: > { %s583_s10 = sadd.s32 4294967295, %s539_s9   ;;  %s372_s11 = sadd.s32 4294967294, %s539_s9   ;;  %s539_s9 = sphi %s568_s9, %s737_s9   ;;  %s535_s8 = sphi %s566_s8, %s736_s8   ;;  %s531_s7 = sphi %s564_s7, %s735_s7   ;;  %s527_s6 = sphi %s562_s6, %s734_s6  }
   0x6   : > { %s587_s12 = sadd.s32 1, %s539_s9   ;;  %s24_s13 = sadd.s32 1, %s535_s8 }
   0x7   : > { %s21_s14 = ssub.s32 %s539_s9, %s587_s12  ;;  %p31_p0 = scmp.ne.s32.totalorder %s535_s8, %s531_s7 }
   0x8   : > { %p22_p1 = scmp.eq.s32.totalorder %s21_s14, 0  ;;  %p32_p2 = scmp.eq.s32.totalorder %s539_s9, 0 }
   0x9   : > { %p37_p3 = scmp.ne.s32.totalorder %s531_s7, %s527_s6  ;;  %p38_p4 = scmp.eq.s32.totalorder %s583_s10, 0 }
   0xa   : > { %s599_s15 = scalar_select %p22_p1, %s535_s8, %s24_s13  }
   0xb   : > { %p601_p5 = por %p32_p2, %p31_p0  ;;  %p605_p6 = por %p38_p4, %p37_p3 }
   0xc   : > { %p61_p7 = scmp.eq.s32.totalorder %s583_s10, 3  ;;  %p67_p8 = scmp.eq.s32.totalorder %s372_s11, 3 }
   0xd   : > { %s727_s17 = scalar_select %p605_p6, 1, 0 }
   0xe   : > { %p404_p9 = scmp.lt.s32.totalorder %s539_s9, 4  ;;  %p611_p10 = por %p61_p7, %p31_p0 }
   0xf   : > { %p615_p11 = por %p67_p8, %p37_p3  ;;  %s87_s20 = sand.u32 1, %s535_s8  }
  0x10   : > { %s728_s18 = scalar_select %p611_p10, 1, 0 }
  0x11   : > { %s729_s19 = scalar_select %p615_p11, 1, 0 }
  0x12   : > { %s389_s21 = sshll.u32 %s539_s9, 9  ;;  %s375_s22 = sshll.u32 %s87_s20, 5 }
  0x13   : > { %s624_s25 = scalar_lea.hbm %s722_s0, %s389_s21  ;;  %s91_s26 = scalar_lea.vmem [#allocation3], %s375_s22 }
  0x14   : > { %s99_s27 = sshll.u32 %s91_s26, 4  ;;  %p628_p12 = pnand %p404_p9, %p601_p5  ;;  %s632_s27 = int_to_ptr.vmem [resolvable:$true] %s99_s27 }
  0x15   : > { %s634_s29 = scalar_lea.sflag [#allocation4], %s87_s20  ;;  %s447_s30 = scalar_lea.hbm %s624_s25, 512 }
  0x16   : > { %p448_p13 = scmp.ne.s32.totalorder %s624_s25, %s447_s30  ;;  %p449_p0 = pneg %p628_p12 }
  0x17   : > { %s452_s4 = scalar_lea.hbm %s722_s0, 2048  ;;  %p453_p3 = scmp.lt.s32.totalorder %s624_s25, %s722_s0 }
  0x18   : > { %p450_p1 = pnand %p449_p0, %p448_p13  ;;  %p454_p4 = scmp.lt.s32.totalorder %s452_s4, %s447_s30 }
  0x1a   : > { %p451_p2 = pneg %p450_p1  ;;  %p455_p5 = por %p454_p4, %p453_p3 }
  0x1c   : > { %p456_p7 = pnand %p455_p5, %p451_p2 }
  0x1e   : > { %459 = shalt.err (!%p456_p7)
}
  0x1f   : > { %s460_s13 = scalar_lea.vmem %s632_s27, 512  ;;  %s541_s14 = smov [#allocation3]  }
  0x20   : > { %p461_p8 = scmp.ne.s32.totalorder %s632_s27, %s460_s13  ;;  %s465_s16 = sshll.u32 %s541_s14, 4  ;;  %s466_s16 = int_to_ptr.vmem [resolvable:$false] %s465_s16 }
  0x21   : > { %s467_s20 = scalar_lea.vmem %s466_s16, 1024  ;;  %p468_p1 = scmp.lt.s32.totalorder %s632_s27, %s466_s16 }
  0x22   : > { %p463_p9 = pnand %p461_p8, %p449_p0  ;;  %p469_p11 = scmp.lt.s32.totalorder %s467_s20, %s460_s13 }
  0x24   : > { %p464_p13 = pneg %p463_p9  ;;  %p470_p10 = por %p469_p11, %p468_p1 }
  0x26   : > { %p471_p6 = pnand %p470_p10, %p464_p13 }
  0x28   : > { %474 = shalt.err (!%p471_p6)
}
  0x29   : > { %s542_s21 = smov 128   ;;  %s543_s22 = smov 8  }
  0x2a   : > { %399 = dma.hbm_to_vmem [thread:$0]  (!%p628_p12), %s624_s25, 512, %s632_s27, %s634_s29, %s542_s21, %s542_s21, %s543_s22  }
  0x2b   : > { %p379_p0 = scmp.ge.s32.totalorder %s539_s9, 1  ;;  %p107_p2 = scmp.lt.s32.totalorder %s539_s9, 5 }
  0x2d   : > { %p108_p3 = pnand %p379_p0, %p107_p2 }
  0x2e   : > { %s658_s23 = sand.u32 (!%p108_p3), 1, %s531_s7   ;;  %p731_p6 = scmp.ne.s32.totalorder (!%p108_p3), %s727_s17, 0 }
  0x2f   : > { %111 = sbr.rel (%p108_p3) target bundleno = 345 (0x159), region = 24  ;;  %s380_s24 = sshll.u32 (!%p108_p3), %s658_s23, 5 }
  0x30   : > { %s114_s26 = scalar_lea.sflag (!%p108_p3), [#allocation4], %s658_s23  ;;  %s117_s30 = scalar_lea.vmem (!%p108_p3), [#allocation3], %s380_s24 }
  0x34   : > { %518 = dma.done.wait (%p731_p6), %s114_s26, 512  }
  0x35   : > { %520 = vsyncadd (%p731_p6), %s114_s26, 4294966784  ;;  %vm138_vm0 = vcmask 154624   ;;  %vm141_vm1 = vcmask 149504   ;;  %v544_v0 = vmov 0.0   ;;  %v148_v1 = vld [vmem:[%s117_s30 + $0x10] sm:$0xff]  ;;  %v146_v2 = vld [vmem:[%s117_s30] sm:$0xff] }
  0x36   : > { %143 = vst.msk [vmem:[#allocation2 + $0x18] sm:$0xff] %vm138_vm0, %v544_v0  ;;  %144 = vst.msk [vmem:[#allocation2 + $0x20] sm:$0xff] %vm138_vm0, %v544_v0  ;;  %s545_s25 = smov 2   ;;  %v149_v3 = vld [vmem:[%s117_s30 + $0x18] sm:$0xff]  ;;  %v147_v4 = vld [vmem:[%s117_s30 + $0x8] sm:$0xff]  ;;  %vm166_vm2 = vcmask 146448  }
  0x37   : > { %139 = vst.msk [vmem:[#allocation2] sm:$0xff] %vm138_vm0, %v544_v0  ;;  %140 = vst.msk [vmem:[#allocation2 + $0x8] sm:$0xff] %vm138_vm0, %v544_v0  ;;  %158 = vrot.lane.b32.xlu1 %v148_v1, %s545_s25  ;;  %154 = vrot.lane.b32.xlu0 %v146_v2, %s545_s25  ;;  %s546_s17 = smov 127   ;;  %s547_s27 = smov 126   ;;  %vm279_vm3 = vcmask 130048  }
  0x38   : > { %145 = vst.msk [vmem:[#allocation2 + $0x28] sm:$0x7] %vm141_vm1, %v544_v0  ;;  %142 = vst.msk [vmem:[#allocation2 + $0x10] sm:$0x7] %vm141_vm1, %v544_v0  ;;  %s548_s28 = smov 125   ;;  %s135_s29 = scalar_lea.vmem [#allocation6], %s380_s24 }
  0x39   : > { %s299_s2 = sshll.u32 %s135_s29, 4  ;;  %s391_s3 = sshll.u32 %s583_s10, 9  ;;  %s672_s2 = int_to_ptr.vmem [resolvable:$true] %s299_s2 }
  0x3a   : > { %s679_s11 = scalar_lea.hbm %s723_s1, %s391_s3  ;;  %s285_s10 = scalar_lea.sflag [#allocation5], %s658_s23 }
  0x3b   : > { %160 = vrot.lane.b32.xlu1 %v149_v3, %s545_s25  ;;  %156 = vrot.lane.b32.xlu0 %v147_v4, %s545_s25  ;;  %s475_s13 = scalar_lea.vmem %s672_s2, 512  ;;  %p732_p11 = scmp.ne.s32.totalorder %s728_s18, 0 }
  0x3c   : > { %p476_p10 = scmp.ne.s32.totalorder %s672_s2, %s475_s13  ;;  %s549_s14 = smov [#allocation6]  }
  0x3d   : > { %s479_s16 = sshll.u32 %s549_s14, 4  ;;  %s480_s16 = int_to_ptr.vmem [resolvable:$false] %s479_s16 }
  0x3e   : > { %p477_p12 = pnand %p476_p10, %p732_p11  ;;  %s481_s20 = scalar_lea.vmem %s480_s16, 1024 }
  0x3f   : > { %p482_p5 = scmp.lt.s32.totalorder %s672_s2, %s480_s16  ;;  %p483_p7 = scmp.lt.s32.totalorder %s481_s20, %s475_s13 }
  0x40   : > { %p478_p4 = pneg %p477_p12 }
  0x41   : > { %p484_p8 = por %p483_p7, %p482_p5 }
  0x43   : > { %p485_p9 = pnand %p484_p8, %p478_p4 }
  0xa9   : > { %v159_v5 = vpop.permute.xlu1 %158  ;;  %v155_v6 = vpop.permute.xlu0 %154 }
  0xaa   : > { %169 = vst.msk [vmem:[#allocation2 + $0x1a] sm:$0xff] %vm166_vm2, %v159_v5  ;;  %167 = vst.msk [vmem:[#allocation2 + $0x2] sm:$0xff] %vm166_vm2, %v155_v6 }
  0xad   : > { %v161_v7 = vpop.permute.xlu1 %160  ;;  %v157_v8 = vpop.permute.xlu0 %156 }
  0xae   : > { %170 = vst.msk [vmem:[#allocation2 + $0x22] sm:$0xff] %vm166_vm2, %v161_v7  ;;  %168 = vst.msk [vmem:[#allocation2 + $0xa] sm:$0xff] %vm166_vm2, %v157_v8 }
  0xb1   : > { %v171_v9 = vld [vmem:[#allocation2] sm:$0xff]  ;;  %v173_v14 = vld [vmem:[#allocation2 + $0x18] sm:$0xff] }
  0xb2   : > { %v179_v10 = vld [vmem:[#allocation2 + $0x1] sm:$0xff]  ;;  %v175_v12 = vmul.f32 0.125, %v171_v9  ;;  %v181_v15 = vld [vmem:[#allocation2 + $0x19] sm:$0xff]  ;;  %v177_v17 = vmul.f32 0.125, %v173_v14 }
  0xb3   : > { %v191_v11 = vld [vmem:[#allocation2 + $0x2] sm:$0xff]  ;;  %v183_v13 = vmul.f32 0.375, %v179_v10  ;;  %v193_v16 = vld [vmem:[#allocation2 + $0x1a] sm:$0xff]  ;;  %v185_v18 = vmul.f32 0.375, %v181_v15 }
  0xb4   : > { %v197_v19 = vmul.f32 0.375, %v193_v16  ;;  %v195_v21 = vmul.f32 0.375, %v191_v11 }
  0xb5   : > { %v187_v20 = vadd.f32 %v183_v13, %v175_v12  ;;  %v203_v22 = vld [vmem:[#allocation2 + $0x3] sm:$0xff]  ;;  %v189_v25 = vadd.f32 %v185_v18, %v177_v17  ;;  %v204_v31 = vld [vmem:[#allocation2 + $0xb] sm:$0xff]  ;;  %v205_v32 = vld [vmem:[#allocation2 + $0x1b] sm:$0xff] }
  0xb6   : > { %v172_v23 = vld [vmem:[#allocation2 + $0x8] sm:$0xff]  ;;  %v207_v27 = vmul.f32 0.125, %v203_v22  ;;  %v209_v35 = vmul.f32 0.125, %v205_v32  ;;  %v174_v36 = vld [vmem:[#allocation2 + $0x20] sm:$0xff]  ;;  %v208_v44 = vmul.f32 0.125, %v204_v31 }
  0xb7   : > { %v180_v24 = vld [vmem:[#allocation2 + $0x9] sm:$0xff]  ;;  %v199_v26 = vadd.f32 %v195_v21, %v187_v20  ;;  %v176_v28 = vmul.f32 0.125, %v172_v23  ;;  %v201_v34 = vadd.f32 %v197_v19, %v189_v25  ;;  %v182_v37 = vld [vmem:[#allocation2 + $0x21] sm:$0xff]  ;;  %v178_v41 = vmul.f32 0.125, %v174_v36 }
  0xb8   : > { %v184_v29 = vmul.f32 0.375, %v180_v24  ;;  %v192_v30 = vld [vmem:[#allocation2 + $0xa] sm:$0xff]  ;;  %v194_v38 = vld [vmem:[#allocation2 + $0x22] sm:$0xff]  ;;  %v186_v42 = vmul.f32 0.375, %v182_v37 }
  0xb9   : > { %v196_v33 = vmul.f32 0.375, %v192_v30  ;;  %v211_v39 = vadd.f32 %v207_v27, %v199_v26  ;;  %v206_v43 = vld [vmem:[#allocation2 + $0x23] sm:$0xff]  ;;  %v213_v45 = vadd.f32 %v209_v35, %v201_v34  ;;  %v198_v46 = vmul.f32 0.375, %v194_v38 }
  0xba   : > { %v188_v40 = vadd.f32 %v184_v29, %v176_v28  ;;  %v190_v49 = vadd.f32 %v186_v42, %v178_v41  ;;  %v210_v50 = vmul.f32 0.125, %v206_v43 }
  0xbb   : > { %v219_v47 = vmul.f32 0.375, %v211_v39  ;;  %v221_v54 = vmul.f32 0.375, %v213_v45  ;;  %v215_v57 = vmul.f32 0.125, %v211_v39  ;;  %v217_v59 = vmul.f32 0.125, %v213_v45 }
  0xbc   : > { %v200_v48 = vadd.f32 %v196_v33, %v188_v40  ;;  %v202_v52 = vadd.f32 %v198_v46, %v190_v49 }
  0xbd   : > { %227 = vrot.lane.b32.xlu0 %v219_v47, %s546_s17 }
  0xbe   : > { %v212_v51 = vadd.f32 %v208_v44, %v200_v48  ;;  %v214_v55 = vadd.f32 %v210_v50, %v202_v52 }
  0xc0   : > { %v220_v53 = vmul.f32 0.375, %v212_v51  ;;  %v222_v56 = vmul.f32 0.375, %v214_v55  ;;  %v216_v58 = vmul.f32 0.125, %v212_v51  ;;  %v218_v60 = vmul.f32 0.125, %v214_v55 }
  0xc1   : > { %231 = vrot.lane.b32.xlu0 %v221_v54, %s546_s17 }
  0xc2   : > { %229 = vrot.lane.b32.xlu1 %v220_v53, %s546_s17 }
  0xc5   : > { %243 = vrot.lane.b32.xlu0 %v219_v47, %s547_s27 }
  0xc6   : > { %233 = vrot.lane.b32.xlu1 %v222_v56, %s546_s17 }
  0xc9   : > { %247 = vrot.lane.b32.xlu0 %v221_v54, %s547_s27 }
  0xca   : > { %245 = vrot.lane.b32.xlu1 %v220_v53, %s547_s27 }
  0xcd   : > { %263 = vrot.lane.b32.xlu0 %v215_v57, %s548_s28 }
  0xce   : > { %249 = vrot.lane.b32.xlu1 %v222_v56, %s547_s27 }
  0xd1   : > { %267 = vrot.lane.b32.xlu0 %v217_v59, %s548_s28 }
  0xd2   : > { %265 = vrot.lane.b32.xlu1 %v216_v58, %s548_s28 }
  0xd6   : > { %269 = vrot.lane.b32.xlu1 %v218_v60, %s548_s28 }
 0x12f   : > { %v228_v61 = vpop.permute.xlu0 %227 }
 0x130   : > { %v239_v4 = vadd.f32 %v228_v61, %v215_v57 }
 0x133   : > { %v232_v63 = vpop.permute.xlu0 %231 }
 0x134   : > { %v230_v62 = vpop.permute.xlu1 %229  ;;  %v241_v9 = vadd.f32 %v232_v63, %v217_v59 }
 0x135   : > { %v240_v8 = vadd.f32 %v230_v62, %v216_v58 }
 0x137   : > { %v244_v1 = vpop.permute.xlu0 %243 }
 0x138   : > { %v234_v0 = vpop.permute.xlu1 %233  ;;  %v255_v5 = vadd.f32 %v244_v1, %v239_v4 }
 0x139   : > { %v242_v15 = vadd.f32 %v234_v0, %v218_v60 }
 0x13b   : > { %v248_v3 = vpop.permute.xlu0 %247 }
 0x13c   : > { %v246_v2 = vpop.permute.xlu1 %245  ;;  %v257_v12 = vadd.f32 %v248_v3, %v241_v9 }
 0x13d   : > { %v256_v11 = vadd.f32 %v246_v2, %v240_v8 }
 0x13f   : > { %v264_v7 = vpop.permute.xlu0 %263 }
 0x140   : > { %v250_v6 = vpop.permute.xlu1 %249  ;;  %v275_v10 = vadd.f32 %v264_v7, %v255_v5 }
 0x141   : > { %v258_v18 = vadd.f32 %v250_v6, %v242_v15 }
 0x142   : > { %280 = vst.msk [vmem:[%s135_s29] sm:$0xff] %vm279_vm3, %v275_v10 }
 0x143   : > { %v268_v14 = vpop.permute.xlu0 %267 }
 0x144   : > { %v266_v13 = vpop.permute.xlu1 %265  ;;  %v277_v17 = vadd.f32 %v268_v14, %v257_v12 }
 0x145   : > { %v276_v16 = vadd.f32 %v266_v13, %v256_v11 }
 0x146   : > { %282 = vst.msk [vmem:[%s135_s29 + $0x10] sm:$0xff] %vm279_vm3, %v277_v17 }
 0x147   : > { %281 = vst.msk [vmem:[%s135_s29 + $0x8] sm:$0xff] %vm279_vm3, %v276_v16 }
 0x148   : > { %v270_v19 = vpop.permute.xlu1 %269 }
 0x149   : > { %v278_v20 = vadd.f32 %v270_v19, %v258_v18 }
 0x14b   : > { %283 = vst.msk [vmem:[%s135_s29 + $0x18] sm:$0xff] %vm279_vm3, %v278_v20 }
 0x14c   : > { %488 = shalt.err (!%p485_p9)
}
 0x14d   : > { %s489_s21 = scalar_lea.hbm %s679_s11, 512  ;;  %s493_s26 = scalar_lea.hbm %s723_s1, 2048 }
 0x14e   : > { %p490_p13 = scmp.ne.s32.totalorder %s679_s11, %s489_s21  ;;  %p494_p2 = scmp.lt.s32.totalorder %s679_s11, %s723_s1 }
 0x14f   : > { %p495_p3 = scmp.lt.s32.totalorder %s493_s26, %s489_s21 }
 0x150   : > { %p491_p1 = pnand %p490_p13, %p732_p11 }
 0x151   : > { %p496_p6 = por %p495_p3, %p494_p2 }
 0x152   : > { %p492_p0 = pneg %p491_p1 }
 0x154   : > { %p497_p10 = pnand %p496_p6, %p492_p0 }
 0x156   : > { %500 = shalt.err (!%p497_p10)
}
 0x157   : > { %s550_s17 = smov 128   ;;  %s551_s27 = smov 8  }
 0x158   : > { %394 = dma.vmem_to_hbm [thread:$0]  (%p732_p11), %s672_s2, 512, %s679_s11, %s285_s10, %s550_s17, %s550_s17, %s551_s27  }
 0x159 PF: > { %p405_p12 = scmp.ge.s32.totalorder %s539_s9, 2  ;;  %s314_s28 = sand.u32 1, %s527_s6  }
 0x15a   : > { %p733_p4 = scmp.ne.s32.totalorder %s729_s19, 0  ;;  %s315_s29 = scalar_lea.sflag [#allocation5], %s314_s28 }
 0x15c   : > { %p401_p5 = pnand %p405_p12, %p733_p4 }
 0x15e   : > { %p402_p7 = pneg %p401_p5 }
 0x160   : > { %522 = dma.done.wait (%p402_p7), %s315_s29, 512  }
 0x161   : > { %524 = vsyncadd (%p402_p7), %s315_s29, 4294966784  ;;  %p14_p8 = scmp.ge.s32.totalorder %s587_s12, 6   ;;  %s734_s6 = smov %s531_s7 }
 0x162   : > { %s735_s7 = smov %s535_s8  ;;  %s736_s8 = smov %s599_s15 }
 0x163   : > { %s737_s9 = smov %s587_s12  ;;  %16 = sbr.rel (!%p14_p8) target bundleno = 5 (0x5), region = 69 }
 0x168   :  { %320 = vsyncpa [#allocation4], 1 }
 0x169   :  { %322 = vsyncpa [#allocation4 + $0x1], 1 }
 0x16a   :  { %323 = vsyncpa [#allocation5], 1 }
 0x16b   :  { %325 = vsyncpa [#allocation5 + $0x1], 1 }

</bundles_post_ra>
